<compile_context>
chip_gen: v7x
topology: tpu7x:2x2x1
jax: 0.10.0
libtpu: 0.0.40
codegen_flags: <defaults>
</compile_context>

<pallas_src>
import functools

import jax
import jax.numpy as jnp
from jax.experimental import pallas as pl
from jax.experimental.pallas import tpu as pltpu

EXPAND = 4
BN_EPS = 1e-5


# ---------------------------------------------------------------------------
# Fused bottleneck kernel
# ---------------------------------------------------------------------------

def _bottleneck_kernel(*refs, downsample):
    if downsample:
        (xs_ref, w1_ref, s1_ref, b1_ref, w2_ref, s2_ref, b2_ref,
         w3_ref, s3_ref, b3_ref, wid_ref, sid_ref, bid_ref,
         o_ref, yp_ref) = refs
    else:
        (xs_ref, w1_ref, s1_ref, b1_ref, w2_ref, s2_ref, b2_ref,
         w3_ref, s3_ref, b3_ref, o_ref, yp_ref) = refs
        wid_ref = sid_ref = bid_ref = None

    _, Ho, Wo, Cin = xs_ref.shape          # full (strided) image for this batch
    Cmid = w1_ref.shape[1]                 # bottleneck width
    TH = o_ref.shape[1] // Wo              # output rows handled by this tile

    ht = pl.program_id(1)
    r0 = ht * TH                           # first output row of this tile

    # ---- Stage 1 (once per image): 1x1 conv + BN + ReLU over the whole slab,
    # written into a zero-padded VMEM scratch that stays resident across the
    # row-tile axis, so the 3x3 halo rows come for free.
    @pl.when(ht == 0)
    def _():
        x2d = xs_ref[0].reshape(Ho * Wo, Cin).astype(jnp.bfloat16)
        y1 = jnp.dot(x2d, w1_ref[...], preferred_element_type=jnp.float32)
        y1 = jnp.maximum(y1 * s1_ref[...] + b1_ref[...], 0.0)
        yp_ref[...] = jnp.zeros_like(yp_ref)
        yp_ref[1:Ho + 1, 1:Wo + 1, :] = y1.reshape(Ho, Wo, Cmid)

    # ---- Stage 2: 3x3 'SAME' conv for this row tile as one im2col matmul.
    cols = []
    for kh in range(3):
        for kw in range(3):
            win = yp_ref[pl.ds(r0 + kh, TH), kw:kw + Wo, :]
            cols.append(win.reshape(TH * Wo, Cmid))
    cols = jnp.concatenate(cols, axis=-1).astype(jnp.bfloat16)   # (TH*Wo, 9*Cmid)
    y2 = jnp.dot(cols, w2_ref[...], preferred_element_type=jnp.float32)
    y2 = jnp.maximum(y2 * s2_ref[...] + b2_ref[...], 0.0)

    # ---- Stage 3: 1x1 expansion conv + BN.
    y3 = jnp.dot(y2.astype(jnp.bfloat16), w3_ref[...],
                 preferred_element_type=jnp.float32)
    y3 = y3 * s3_ref[...] + b3_ref[...]

    # ---- Identity / downsample branch for this row tile.
    x_tile = xs_ref[0, pl.ds(r0, TH)].reshape(TH * Wo, Cin)
    if downsample:
        ident = jnp.dot(x_tile.astype(jnp.bfloat16), wid_ref[...],
                        preferred_element_type=jnp.float32)
        ident = ident * sid_ref[...] + bid_ref[...]
    else:
        ident = x_tile.astype(jnp.float32)

    # ---- Residual add + ReLU, one dense slab store per tile.
    o_ref[0] = jnp.maximum(y3 + ident, 0.0).astype(o_ref.dtype)


# ---------------------------------------------------------------------------
# Wrapper
# ---------------------------------------------------------------------------

def _pick_row_tile(ho, wo, target_rows=256):
    """Largest divisor of `ho` whose tile (th*wo matmul rows) fits the target
    and, when possible, leaves >= 2 row-tiles so the pipelined axis has real
    extent."""
    divs = [t for t in range(1, ho + 1) if ho % t == 0]
    fits = [t for t in divs if t * wo <= target_rows] or [1]
    multi = [t for t in fits if ho // t >= 2]
    return max(multi) if multi else max(fits)


def bottleneck_forward_nhwc(x_nhwc, params):
    """Fused bottleneck forward, NHWC in / NHWC out, single pallas_call."""
    stride = params["stride"]
    xs = x_nhwc[:, ::stride, ::stride, :]        # stride lives on the 1x1 convs
    N, Ho, Wo, Cin = xs.shape
    Cmid = params["w1"].shape[1]
    Cexp = Cmid * EXPAND
    downsample = params["downsample"]

    TH = _pick_row_tile(Ho, Wo)
    HT = Ho // TH

    # bf16 MXU operands (f32 accumulation in-kernel); folded BN stays f32.
    w1 = params["w1"].astype(jnp.bfloat16)
    w2 = params["w2"].reshape(9 * Cmid, Cmid).astype(jnp.bfloat16)  # im2col layout
    w3 = params["w3"].astype(jnp.bfloat16)

    inputs = [xs, w1, params["scale1"], params["bias1"],
              w2, params["scale2"], params["bias2"],
              w3, params["scale3"], params["bias3"]]

    def _rep(shape):  # replicated (same block every grid step)
        nd = len(shape)
        return pl.BlockSpec(shape, lambda n, h, _nd=nd: (0,) * _nd)

    in_specs = [
        pl.BlockSpec((1, Ho, Wo, Cin), lambda n, h: (n, 0, 0, 0)),
        _rep((Cin, Cmid)), _rep((1, Cmid)), _rep((1, Cmid)),
        _rep((9 * Cmid, Cmid)), _rep((1, Cmid)), _rep((1, Cmid)),
        _rep((Cmid, Cexp)), _rep((1, Cexp)), _rep((1, Cexp)),
    ]
    if downsample:
        inputs += [params["w_id"].astype(jnp.bfloat16),
                   params["scale_id"], params["bias_id"]]
        in_specs += [_rep((Cin, Cexp)), _rep((1, Cexp)), _rep((1, Cexp))]

    kern = functools.partial(_bottleneck_kernel, downsample=downsample)
    out = pl.pallas_call(
        kern,
        out_shape=jax.ShapeDtypeStruct((N, Ho * Wo, Cexp), x_nhwc.dtype),
        grid_spec=pltpu.PrefetchScalarGridSpec(
            num_scalar_prefetch=0,
            grid=(N, HT),
            in_specs=in_specs,
            out_specs=pl.BlockSpec((1, TH * Wo, Cexp), lambda n, h: (n, h, 0)),
            scratch_shapes=[pltpu.VMEM((Ho + 2, Wo + 2, Cmid), jnp.float32)],
        ),
        compiler_params=pltpu.CompilerParams(
            dimension_semantics=("parallel", "arbitrary"),
            vmem_limit_bytes=32 * 1024 * 1024,
        ),
    )(*inputs)
    return out.reshape(N, Ho, Wo, Cexp)


def bottleneck_forward(x_nchw, params):
    # NCHW boundary wrapper (PyTorch convention).  In a stacked ResNet keep
    # activations NHWC between blocks and only transpose at the network edge.
    x = jnp.transpose(x_nchw, (0, 2, 3, 1))
    out = bottleneck_forward_nhwc(x, params)
    return jnp.transpose(out, (0, 3, 1, 2))


# ---------------------------------------------------------------------------
# Parameter init (deterministic, synthetic) and pure-JAX reference
# ---------------------------------------------------------------------------

def _fold_bn(gamma, beta, mean, var):
    scale = gamma / jnp.sqrt(var + BN_EPS)
    bias = beta - mean * scale
    return scale.astype(jnp.float32), bias.astype(jnp.float32)


def init_params(key, in_size, out_size, stride):
    ks = jax.random.split(key, 20)
    c_exp = out_size * EXPAND
    downsample = (stride != 1) or (in_size != c_exp)

    def conv1x1(k, cin, cout):
        return jax.random.normal(k, (cin, cout), jnp.float32) * 0.1

    def bn_params(kg, kb, km, kv, c):
        gamma = 1.0 + 0.1 * jax.random.normal(kg, (1, c), jnp.float32)
        beta = 0.1 * jax.random.normal(kb, (1, c), jnp.float32)
        mean = 0.1 * jax.random.normal(km, (1, c), jnp.float32)
        var = 1.0 + 0.1 * jnp.abs(jax.random.normal(kv, (1, c), jnp.float32))
        return _fold_bn(gamma, beta, mean, var)

    p = {"downsample": downsample, "stride": stride}
    p["w1"] = conv1x1(ks[0], in_size, out_size)                        # 1x1
    p["scale1"], p["bias1"] = bn_params(ks[1], ks[2], ks[3], ks[4], out_size)
    p["w2"] = jax.random.normal(ks[5], (3, 3, out_size, out_size),
                                jnp.float32) * 0.1                     # 3x3 HWIO
    p["scale2"], p["bias2"] = bn_params(ks[6], ks[7], ks[8], ks[9], out_size)
    p["w3"] = conv1x1(ks[10], out_size, c_exp)                         # 1x1
    p["scale3"], p["bias3"] = bn_params(ks[11], ks[12], ks[13], ks[14], c_exp)
    if downsample:
        p["w_id"] = conv1x1(ks[15], in_size, c_exp)                    # 1x1
        p["scale_id"], p["bias_id"] = bn_params(ks[16], ks[17], ks[18], ks[19], c_exp)
    return p


def bottleneck_reference(x_nchw, params):
    """Pure-JAX (f32) reference for correctness checking."""
    stride = params["stride"]
    x = jnp.transpose(x_nchw, (0, 2, 3, 1))
    xs = x[:, ::stride, ::stride, :]

    def bn(y, scale, bias):
        return y * scale.reshape(1, 1, 1, -1) + bias.reshape(1, 1, 1, -1)

    y1 = jnp.einsum("nhwc,cd->nhwd", xs, params["w1"])
    y1 = jax.nn.relu(bn(y1, params["scale1"], params["bias1"]))
    y2 = jax.lax.conv_general_dilated(
        y1, params["w2"], window_strides=(1, 1), padding="SAME",
        dimension_numbers=("NHWC", "HWIO", "NHWC"))
    y2 = jax.nn.relu(bn(y2, params["scale2"], params["bias2"]))
    y3 = bn(jnp.einsum("nhwc,cd->nhwd", y2, params["w3"]),
            params["scale3"], params["bias3"])
    if params["downsample"]:
        ident = bn(jnp.einsum("nhwc,cd->nhwd", xs, params["w_id"]),
                   params["scale_id"], params["bias_id"])
    else:
        ident = xs
    out = jax.nn.relu(y3 + ident)
    return jnp.transpose(out, (0, 3, 1, 2))


if __name__ == "__main__":
    key = jax.random.PRNGKey(0)
    k_x1, k_p1, k_x2, k_p2 = jax.random.split(key, 4)

    # Config A: stride-2 block with downsample branch.
    in_size, out_size, stride = 8, 4, 2
    x = jax.random.normal(k_x1, (2, in_size, 16, 16), jnp.float32)     # NCHW
    params = init_params(k_p1, in_size, out_size, stride)
    out = jax.block_until_ready(bottleneck_forward(x, params))
    ref = jax.block_until_ready(bottleneck_reference(x, params))
    assert out.shape == (2, out_size * EXPAND, 8, 8), out.shape
    err = float(jnp.max(jnp.abs(out - ref)))
    assert jnp.allclose(out, ref, rtol=2e-2, atol=2e-2), err           # bf16 MXU tol

    # Config B: stride-1 identity (no-downsample) block.
    in_size, out_size, stride = 16, 4, 1
    x = jax.random.normal(k_x2, (2, in_size, 8, 8), jnp.float32)       # NCHW
    params = init_params(k_p2, in_size, out_size, stride)
    out = jax.block_until_ready(bottleneck_forward(x, params))
    ref = jax.block_until_ready(bottleneck_reference(x, params))
    assert out.shape == (2, out_size * EXPAND, 8, 8), out.shape
    err = float(jnp.max(jnp.abs(out - ref)))
    assert jnp.allclose(out, ref, rtol=2e-2, atol=2e-2), err

    print("KERNEL_OK")
</pallas_src>

<mosaic_0001>
module attributes {stable_mosaic.version = 11 : i64} {
  func.func @_bottleneck_kernel(%arg0: i32, %arg1: i32, %arg2: memref<1x8x8x8xf32, #tpu.memory_space<vmem>>, %arg3: memref<8x4xbf16, #tpu.memory_space<vmem>>, %arg4: memref<1x4xf32, #tpu.memory_space<vmem>>, %arg5: memref<1x4xf32, #tpu.memory_space<vmem>>, %arg6: memref<36x4xbf16, #tpu.memory_space<vmem>>, %arg7: memref<1x4xf32, #tpu.memory_space<vmem>>, %arg8: memref<1x4xf32, #tpu.memory_space<vmem>>, %arg9: memref<4x16xbf16, #tpu.memory_space<vmem>>, %arg10: memref<1x16xf32, #tpu.memory_space<vmem>>, %arg11: memref<1x16xf32, #tpu.memory_space<vmem>>, %arg12: memref<8x16xbf16, #tpu.memory_space<vmem>>, %arg13: memref<1x16xf32, #tpu.memory_space<vmem>>, %arg14: memref<1x16xf32, #tpu.memory_space<vmem>>, %arg15: memref<1x32x16xf32, #tpu.memory_space<vmem>>, %arg16: memref<10x10x4xf32, #tpu.memory_space<vmem>>) attributes {dimension_semantics = [#tpu.dimension_semantics<parallel>, #tpu.dimension_semantics<arbitrary>], iteration_bounds = array<i64: 2, 2>, scalar_prefetch = 0 : i64, scratch_operands = 1 : i64, tpu.core_type = #tpu.core_type<tc>, window_params = [{transform_indices = @transform_0, window_bounds = array<i64: 1, 8, 8, 8>}, {pipeline_mode = #tpu.pipeline_mode<synchronous>, transform_indices = @transform_1, window_bounds = array<i64: 8, 4>}, {pipeline_mode = #tpu.pipeline_mode<synchronous>, transform_indices = @transform_2, window_bounds = array<i64: 1, 4>}, {pipeline_mode = #tpu.pipeline_mode<synchronous>, transform_indices = @transform_3, window_bounds = array<i64: 1, 4>}, {pipeline_mode = #tpu.pipeline_mode<synchronous>, transform_indices = @transform_4, window_bounds = array<i64: 36, 4>}, {pipeline_mode = #tpu.pipeline_mode<synchronous>, transform_indices = @transform_5, window_bounds = array<i64: 1, 4>}, {pipeline_mode = #tpu.pipeline_mode<synchronous>, transform_indices = @transform_6, window_bounds = array<i64: 1, 4>}, {pipeline_mode = #tpu.pipeline_mode<synchronous>, transform_indices = @transform_7, window_bounds = array<i64: 4, 16>}, {pipeline_mode = #tpu.pipeline_mode<synchronous>, transform_indices = @transform_8, window_bounds = array<i64: 1, 16>}, {pipeline_mode = #tpu.pipeline_mode<synchronous>, transform_indices = @transform_9, window_bounds = array<i64: 1, 16>}, {pipeline_mode = #tpu.pipeline_mode<synchronous>, transform_indices = @transform_10, window_bounds = array<i64: 8, 16>}, {pipeline_mode = #tpu.pipeline_mode<synchronous>, transform_indices = @transform_11, window_bounds = array<i64: 1, 16>}, {pipeline_mode = #tpu.pipeline_mode<synchronous>, transform_indices = @transform_12, window_bounds = array<i64: 1, 16>}, {transform_indices = @transform_13, window_bounds = array<i64: 1, 32, 16>}]} {
    %c4_i32 = arith.constant 4 : i32
    %0 = arith.muli %arg1, %c4_i32 : i32
    %c0_i32 = arith.constant 0 : i32
    %1 = arith.cmpi eq, %arg1, %c0_i32 : i32
    %2 = arith.extui %1 : i1 to i32
    %c0_i32_0 = arith.constant 0 : i32
    %3 = arith.cmpi ne, %2, %c0_i32_0 : i32
    scf.if %3 {
      %c0_51 = arith.constant 0 : index
      %c0_52 = arith.constant 0 : index
      %c0_53 = arith.constant 0 : index
      %c0_54 = arith.constant 0 : index
      %80 = vector.load %arg2[%c0_51, %c0_52, %c0_53, %c0_54] : memref<1x8x8x8xf32, #tpu.memory_space<vmem>>, vector<1x8x8x8xf32>
      %81 = vector.shape_cast %80 : vector<1x8x8x8xf32> to vector<8x8x8xf32>
      %82 = vector.shape_cast %81 : vector<8x8x8xf32> to vector<64x8xf32>
      %83 = arith.truncf %82 : vector<64x8xf32> to vector<64x8xbf16>
      %c0_55 = arith.constant 0 : index
      %c0_56 = arith.constant 0 : index
      %84 = vector.load %arg3[%c0_55, %c0_56] : memref<8x4xbf16, #tpu.memory_space<vmem>>, vector<8x4xbf16>
      %cst_57 = arith.constant dense<0.000000e+00> : vector<64x4xf32>
      %85 = tpu.matmul %83, %84, %cst_57 {dimension_numbers = #tpu.dot_dimension_numbers<[1], [0], [0], [1], [0, 0, 1, 1], [], []>} : vector<64x8xbf16>, vector<8x4xbf16>, vector<64x4xf32> -> vector<64x4xf32>
      %c0_58 = arith.constant 0 : index
      %c0_59 = arith.constant 0 : index
      %86 = vector.load %arg4[%c0_58, %c0_59] : memref<1x4xf32, #tpu.memory_space<vmem>>, vector<1x4xf32>
      %87 = vector.broadcast %86 : vector<1x4xf32> to vector<64x4xf32>
      %88 = arith.mulf %85, %87 : vector<64x4xf32>
      %c0_60 = arith.constant 0 : index
      %c0_61 = arith.constant 0 : index
      %89 = vector.load %arg5[%c0_60, %c0_61] : memref<1x4xf32, #tpu.memory_space<vmem>>, vector<1x4xf32>
      %90 = vector.broadcast %89 : vector<1x4xf32> to vector<64x4xf32>
      %91 = arith.addf %88, %90 : vector<64x4xf32>
      %cst_62 = arith.constant 0.000000e+00 : f32
      %92 = vector.broadcast %cst_62 : f32 to vector<64x4xf32>
      %93 = arith.maximumf %91, %92 : vector<64x4xf32>
      %cst_63 = arith.constant 0.000000e+00 : f32
      %94 = vector.broadcast %cst_63 : f32 to vector<10x10x4xf32>
      %c0_64 = arith.constant 0 : index
      %c0_65 = arith.constant 0 : index
      %c0_66 = arith.constant 0 : index
      %95 = vector.load %arg16[%c0_64, %c0_65, %c0_66] : memref<10x10x4xf32, #tpu.memory_space<vmem>>, vector<10x10x4xf32>
      tpu.vector_store %arg16[%c0_64, %c0_65, %c0_66], %94 {strides = array<i32>} : memref<10x10x4xf32, #tpu.memory_space<vmem>>, vector<10x10x4xf32>,
      %96 = vector.shape_cast %93 : vector<64x4xf32> to vector<8x8x4xf32>
      %c1_67 = arith.constant 1 : index
      %c1_68 = arith.constant 1 : index
      %c0_69 = arith.constant 0 : index
      %97 = vector.load %arg16[%c1_67, %c1_68, %c0_69] : memref<10x10x4xf32, #tpu.memory_space<vmem>>, vector<8x8x4xf32>
      tpu.vector_store %arg16[%c1_67, %c1_68, %c0_69], %96 {strides = array<i32>} : memref<10x10x4xf32, #tpu.memory_space<vmem>>, vector<8x8x4xf32>,
    } else {
    }
    %c0_i32_1 = arith.constant 0 : i32
    %4 = arith.addi %0, %c0_i32_1 : i32
    %5 = arith.index_cast %4 : i32 to index
    %c0 = arith.constant 0 : index
    %c0_2 = arith.constant 0 : index
    %6 = vector.load %arg16[%5, %c0, %c0_2] : memref<10x10x4xf32, #tpu.memory_space<vmem>>, vector<4x8x4xf32>
    %7 = vector.shape_cast %6 : vector<4x8x4xf32> to vector<32x4xf32>
    %c0_i32_3 = arith.constant 0 : i32
    %8 = arith.addi %0, %c0_i32_3 : i32
    %9 = arith.index_cast %8 : i32 to index
    %c1 = arith.constant 1 : index
    %c0_4 = arith.constant 0 : index
    %10 = vector.load %arg16[%9, %c1, %c0_4] : memref<10x10x4xf32, #tpu.memory_space<vmem>>, vector<4x8x4xf32>
    %11 = vector.shape_cast %10 : vector<4x8x4xf32> to vector<32x4xf32>
    %c0_i32_5 = arith.constant 0 : i32
    %12 = arith.addi %0, %c0_i32_5 : i32
    %13 = arith.index_cast %12 : i32 to index
    %c2 = arith.constant 2 : index
    %c0_6 = arith.constant 0 : index
    %14 = vector.load %arg16[%13, %c2, %c0_6] : memref<10x10x4xf32, #tpu.memory_space<vmem>>, vector<4x8x4xf32>
    %15 = vector.shape_cast %14 : vector<4x8x4xf32> to vector<32x4xf32>
    %c1_i32 = arith.constant 1 : i32
    %16 = arith.addi %0, %c1_i32 : i32
    %17 = arith.index_cast %16 : i32 to index
    %c0_7 = arith.constant 0 : index
    %c0_8 = arith.constant 0 : index
    %18 = vector.load %arg16[%17, %c0_7, %c0_8] : memref<10x10x4xf32, #tpu.memory_space<vmem>>, vector<4x8x4xf32>
    %19 = vector.shape_cast %18 : vector<4x8x4xf32> to vector<32x4xf32>
    %c1_i32_9 = arith.constant 1 : i32
    %20 = arith.addi %0, %c1_i32_9 : i32
    %21 = arith.index_cast %20 : i32 to index
    %c1_10 = arith.constant 1 : index
    %c0_11 = arith.constant 0 : index
    %22 = vector.load %arg16[%21, %c1_10, %c0_11] : memref<10x10x4xf32, #tpu.memory_space<vmem>>, vector<4x8x4xf32>
    %23 = vector.shape_cast %22 : vector<4x8x4xf32> to vector<32x4xf32>
    %c1_i32_12 = arith.constant 1 : i32
    %24 = arith.addi %0, %c1_i32_12 : i32
    %25 = arith.index_cast %24 : i32 to index
    %c2_13 = arith.constant 2 : index
    %c0_14 = arith.constant 0 : index
    %26 = vector.load %arg16[%25, %c2_13, %c0_14] : memref<10x10x4xf32, #tpu.memory_space<vmem>>, vector<4x8x4xf32>
    %27 = vector.shape_cast %26 : vector<4x8x4xf32> to vector<32x4xf32>
    %c2_i32 = arith.constant 2 : i32
    %28 = arith.addi %0, %c2_i32 : i32
    %29 = arith.index_cast %28 : i32 to index
    %c0_15 = arith.constant 0 : index
    %c0_16 = arith.constant 0 : index
    %30 = vector.load %arg16[%29, %c0_15, %c0_16] : memref<10x10x4xf32, #tpu.memory_space<vmem>>, vector<4x8x4xf32>
    %31 = vector.shape_cast %30 : vector<4x8x4xf32> to vector<32x4xf32>
    %c2_i32_17 = arith.constant 2 : i32
    %32 = arith.addi %0, %c2_i32_17 : i32
    %33 = arith.index_cast %32 : i32 to index
    %c1_18 = arith.constant 1 : index
    %c0_19 = arith.constant 0 : index
    %34 = vector.load %arg16[%33, %c1_18, %c0_19] : memref<10x10x4xf32, #tpu.memory_space<vmem>>, vector<4x8x4xf32>
    %35 = vector.shape_cast %34 : vector<4x8x4xf32> to vector<32x4xf32>
    %c2_i32_20 = arith.constant 2 : i32
    %36 = arith.addi %0, %c2_i32_20 : i32
    %37 = arith.index_cast %36 : i32 to index
    %c2_21 = arith.constant 2 : index
    %c0_22 = arith.constant 0 : index
    %38 = vector.load %arg16[%37, %c2_21, %c0_22] : memref<10x10x4xf32, #tpu.memory_space<vmem>>, vector<4x8x4xf32>
    %39 = vector.shape_cast %38 : vector<4x8x4xf32> to vector<32x4xf32>
    %40 = tpu.concatenate %7, %11, %15, %19, %23, %27, %31, %35, %39 in 1 : vector<32x4xf32>, vector<32x4xf32>, vector<32x4xf32>, vector<32x4xf32>, vector<32x4xf32>, vector<32x4xf32>, vector<32x4xf32>, vector<32x4xf32>, vector<32x4xf32> -> vector<32x36xf32>
    %41 = arith.truncf %40 : vector<32x36xf32> to vector<32x36xbf16>
    %c0_23 = arith.constant 0 : index
    %c0_24 = arith.constant 0 : index
    %42 = vector.load %arg6[%c0_23, %c0_24] : memref<36x4xbf16, #tpu.memory_space<vmem>>, vector<36x4xbf16>
    %cst = arith.constant dense<0.000000e+00> : vector<32x4xf32>
    %43 = tpu.matmul %41, %42, %cst {dimension_numbers = #tpu.dot_dimension_numbers<[1], [0], [0], [1], [0, 0, 1, 1], [], []>} : vector<32x36xbf16>, vector<36x4xbf16>, vector<32x4xf32> -> vector<32x4xf32>
    %c0_25 = arith.constant 0 : index
    %c0_26 = arith.constant 0 : index
    %44 = vector.load %arg7[%c0_25, %c0_26] : memref<1x4xf32, #tpu.memory_space<vmem>>, vector<1x4xf32>
    %45 = vector.broadcast %44 : vector<1x4xf32> to vector<32x4xf32>
    %46 = arith.mulf %43, %45 : vector<32x4xf32>
    %c0_27 = arith.constant 0 : index
    %c0_28 = arith.constant 0 : index
    %47 = vector.load %arg8[%c0_27, %c0_28] : memref<1x4xf32, #tpu.memory_space<vmem>>, vector<1x4xf32>
    %48 = vector.broadcast %47 : vector<1x4xf32> to vector<32x4xf32>
    %49 = arith.addf %46, %48 : vector<32x4xf32>
    %cst_29 = arith.constant 0.000000e+00 : f32
    %50 = vector.broadcast %cst_29 : f32 to vector<32x4xf32>
    %51 = arith.maximumf %49, %50 : vector<32x4xf32>
    %52 = arith.truncf %51 : vector<32x4xf32> to vector<32x4xbf16>
    %c0_30 = arith.constant 0 : index
    %c0_31 = arith.constant 0 : index
    %53 = vector.load %arg9[%c0_30, %c0_31] : memref<4x16xbf16, #tpu.memory_space<vmem>>, vector<4x16xbf16>
    %cst_32 = arith.constant dense<0.000000e+00> : vector<32x16xf32>
    %54 = tpu.matmul %52, %53, %cst_32 {dimension_numbers = #tpu.dot_dimension_numbers<[1], [0], [0], [1], [0, 0, 1, 1], [], []>} : vector<32x4xbf16>, vector<4x16xbf16>, vector<32x16xf32> -> vector<32x16xf32>
    %c0_33 = arith.constant 0 : index
    %c0_34 = arith.constant 0 : index
    %55 = vector.load %arg10[%c0_33, %c0_34] : memref<1x16xf32, #tpu.memory_space<vmem>>, vector<1x16xf32>
    %56 = vector.broadcast %55 : vector<1x16xf32> to vector<32x16xf32>
    %57 = arith.mulf %54, %56 : vector<32x16xf32>
    %c0_35 = arith.constant 0 : index
    %c0_36 = arith.constant 0 : index
    %58 = vector.load %arg11[%c0_35, %c0_36] : memref<1x16xf32, #tpu.memory_space<vmem>>, vector<1x16xf32>
    %59 = vector.broadcast %58 : vector<1x16xf32> to vector<32x16xf32>
    %60 = arith.addf %57, %59 : vector<32x16xf32>
    %c0_37 = arith.constant 0 : index
    %61 = arith.index_cast %0 : i32 to index
    %c0_38 = arith.constant 0 : index
    %c0_39 = arith.constant 0 : index
    %62 = vector.load %arg2[%c0_37, %61, %c0_38, %c0_39] : memref<1x8x8x8xf32, #tpu.memory_space<vmem>>, vector<1x4x8x8xf32>
    %63 = vector.shape_cast %62 : vector<1x4x8x8xf32> to vector<4x8x8xf32>
    %64 = vector.shape_cast %63 : vector<4x8x8xf32> to vector<32x8xf32>
    %65 = arith.truncf %64 : vector<32x8xf32> to vector<32x8xbf16>
    %c0_40 = arith.constant 0 : index
    %c0_41 = arith.constant 0 : index
    %66 = vector.load %arg12[%c0_40, %c0_41] : memref<8x16xbf16, #tpu.memory_space<vmem>>, vector<8x16xbf16>
    %cst_42 = arith.constant dense<0.000000e+00> : vector<32x16xf32>
    %67 = tpu.matmul %65, %66, %cst_42 {dimension_numbers = #tpu.dot_dimension_numbers<[1], [0], [0], [1], [0, 0, 1, 1], [], []>} : vector<32x8xbf16>, vector<8x16xbf16>, vector<32x16xf32> -> vector<32x16xf32>
    %c0_43 = arith.constant 0 : index
    %c0_44 = arith.constant 0 : index
    %68 = vector.load %arg13[%c0_43, %c0_44] : memref<1x16xf32, #tpu.memory_space<vmem>>, vector<1x16xf32>
    %69 = vector.broadcast %68 : vector<1x16xf32> to vector<32x16xf32>
    %70 = arith.mulf %67, %69 : vector<32x16xf32>
    %c0_45 = arith.constant 0 : index
    %c0_46 = arith.constant 0 : index
    %71 = vector.load %arg14[%c0_45, %c0_46] : memref<1x16xf32, #tpu.memory_space<vmem>>, vector<1x16xf32>
    %72 = vector.broadcast %71 : vector<1x16xf32> to vector<32x16xf32>
    %73 = arith.addf %70, %72 : vector<32x16xf32>
    %74 = arith.addf %60, %73 : vector<32x16xf32>
    %cst_47 = arith.constant 0.000000e+00 : f32
    %75 = vector.broadcast %cst_47 : f32 to vector<32x16xf32>
    %76 = arith.maximumf %74, %75 : vector<32x16xf32>
    %c0_48 = arith.constant 0 : index
    %c0_49 = arith.constant 0 : index
    %c0_50 = arith.constant 0 : index
    %77 = vector.load %arg15[%c0_48, %c0_49, %c0_50] : memref<1x32x16xf32, #tpu.memory_space<vmem>>, vector<1x32x16xf32>
    %78 = vector.shape_cast %77 : vector<1x32x16xf32> to vector<32x16xf32>
    %79 = vector.shape_cast %76 : vector<32x16xf32> to vector<1x32x16xf32>
    tpu.vector_store %arg15[%c0_48, %c0_49, %c0_50], %79 {strides = array<i32>} : memref<1x32x16xf32, #tpu.memory_space<vmem>>, vector<1x32x16xf32>,
    return
  }
  func.func @transform_0(%arg0: i32, %arg1: i32) -> (i32, i32, i32, i32) {
    %c0_i32 = arith.constant 0 : i32
    %c0_i32_0 = arith.constant 0 : i32
    %c0_i32_1 = arith.constant 0 : i32
    %c0_i32_2 = arith.constant 0 : i32
    return %arg0, %c0_i32, %c0_i32_0, %c0_i32_1 : i32, i32, i32, i32
  }
  func.func @transform_1(%arg0: i32, %arg1: i32) -> (i32, i32) {
    %c0_i32 = arith.constant 0 : i32
    %c0_i32_0 = arith.constant 0 : i32
    %c0_i32_1 = arith.constant 0 : i32
    return %c0_i32, %c0_i32_0 : i32, i32
  }
  func.func @transform_2(%arg0: i32, %arg1: i32) -> (i32, i32) {
    %c0_i32 = arith.constant 0 : i32
    %c0_i32_0 = arith.constant 0 : i32
    %c0_i32_1 = arith.constant 0 : i32
    return %c0_i32, %c0_i32_0 : i32, i32
  }
  func.func @transform_3(%arg0: i32, %arg1: i32) -> (i32, i32) {
    %c0_i32 = arith.constant 0 : i32
    %c0_i32_0 = arith.constant 0 : i32
    %c0_i32_1 = arith.constant 0 : i32
    return %c0_i32, %c0_i32_0 : i32, i32
  }
  func.func @transform_4(%arg0: i32, %arg1: i32) -> (i32, i32) {
    %c0_i32 = arith.constant 0 : i32
    %c0_i32_0 = arith.constant 0 : i32
    %c0_i32_1 = arith.constant 0 : i32
    return %c0_i32, %c0_i32_0 : i32, i32
  }
  func.func @transform_5(%arg0: i32, %arg1: i32) -> (i32, i32) {
    %c0_i32 = arith.constant 0 : i32
    %c0_i32_0 = arith.constant 0 : i32
    %c0_i32_1 = arith.constant 0 : i32
    return %c0_i32, %c0_i32_0 : i32, i32
  }
  func.func @transform_6(%arg0: i32, %arg1: i32) -> (i32, i32) {
    %c0_i32 = arith.constant 0 : i32
    %c0_i32_0 = arith.constant 0 : i32
    %c0_i32_1 = arith.constant 0 : i32
    return %c0_i32, %c0_i32_0 : i32, i32
  }
  func.func @transform_7(%arg0: i32, %arg1: i32) -> (i32, i32) {
    %c0_i32 = arith.constant 0 : i32
    %c0_i32_0 = arith.constant 0 : i32
    %c0_i32_1 = arith.constant 0 : i32
    return %c0_i32, %c0_i32_0 : i32, i32
  }
  func.func @transform_8(%arg0: i32, %arg1: i32) -> (i32, i32) {
    %c0_i32 = arith.constant 0 : i32
    %c0_i32_0 = arith.constant 0 : i32
    %c0_i32_1 = arith.constant 0 : i32
    return %c0_i32, %c0_i32_0 : i32, i32
  }
  func.func @transform_9(%arg0: i32, %arg1: i32) -> (i32, i32) {
    %c0_i32 = arith.constant 0 : i32
    %c0_i32_0 = arith.constant 0 : i32
    %c0_i32_1 = arith.constant 0 : i32
    return %c0_i32, %c0_i32_0 : i32, i32
  }
  func.func @transform_10(%arg0: i32, %arg1: i32) -> (i32, i32) {
    %c0_i32 = arith.constant 0 : i32
    %c0_i32_0 = arith.constant 0 : i32
    %c0_i32_1 = arith.constant 0 : i32
    return %c0_i32, %c0_i32_0 : i32, i32
  }
  func.func @transform_11(%arg0: i32, %arg1: i32) -> (i32, i32) {
    %c0_i32 = arith.constant 0 : i32
    %c0_i32_0 = arith.constant 0 : i32
    %c0_i32_1 = arith.constant 0 : i32
    return %c0_i32, %c0_i32_0 : i32, i32
  }
  func.func @transform_12(%arg0: i32, %arg1: i32) -> (i32, i32) {
    %c0_i32 = arith.constant 0 : i32
    %c0_i32_0 = arith.constant 0 : i32
    %c0_i32_1 = arith.constant 0 : i32
    return %c0_i32, %c0_i32_0 : i32, i32
  }
  func.func @transform_13(%arg0: i32, %arg1: i32) -> (i32, i32, i32) {
    %c0_i32 = arith.constant 0 : i32
    %c0_i32_0 = arith.constant 0 : i32
    return %arg0, %arg1, %c0_i32 : i32, i32, i32
  }
}

</mosaic_0001>

<bundles_post_ra>
// kernel: tpu_custom_call.1
= control target key start
LH: loop header
LB: loop body
LE: loop exit
PB: predicated region body
PF: predicated region fallthrough
CT: control target
= control target key end

     0   :  { %s2055_s0 = inlined_call_operand.hbm [shape: f32[2,8,8,8], index: 0, kind: input, shape index: {}]   ;;  %s2056_s1 = inlined_call_operand.vmem [shape: bf16[8,4], index: 1, kind: input, shape index: {}]   ;;  %s2057_s2 = inlined_call_operand.vmem [shape: f32[1,4], index: 2, kind: input, shape index: {}]   ;;  %s2058_s3 = inlined_call_operand.vmem [shape: f32[1,4], index: 3, kind: input, shape index: {}]   ;;  %s2059_s4 = inlined_call_operand.vmem [shape: bf16[36,4], index: 4, kind: input, shape index: {}]   ;;  %s2060_s5 = inlined_call_operand.vmem [shape: f32[1,4], index: 5, kind: input, shape index: {}]   ;;  %s2061_s6 = inlined_call_operand.vmem [shape: f32[1,4], index: 6, kind: input, shape index: {}]   ;;  %s2062_s7 = inlined_call_operand.vmem [shape: bf16[4,16], index: 7, kind: input, shape index: {}]   ;;  %s2063_s8 = inlined_call_operand.vmem [shape: f32[1,16], index: 8, kind: input, shape index: {}]   ;;  %s2064_s9 = inlined_call_operand.vmem [shape: f32[1,16], index: 9, kind: input, shape index: {}]   ;;  %s2065_s10 = inlined_call_operand.vmem [shape: bf16[8,16], index: 10, kind: input, shape index: {}]   ;;  %s2066_s11 = inlined_call_operand.vmem [shape: f32[1,16], index: 11, kind: input, shape index: {}]   ;;  %s2067_s12 = inlined_call_operand.vmem [shape: f32[1,16], index: 12, kind: input, shape index: {}]   ;;  %s2068_s13 = inlined_call_operand.vmem [shape: f32[2,64,16], index: 13, kind: output, shape index: {}]  }
   0x1   :  { %2071 = sst [smem:[#allocation9_spill]] %s2064_s9 }
   0x2   :  { %2072 = sst [smem:[#allocation10_spill]] %s2066_s11 }
   0x3   :  { %2073 = sst [smem:[#allocation11_spill]] %s2067_s12 }
   0x4   :  { %18 = vsyncpa [#allocation4], 0 }
   0x5   :  { %20 = vsyncpa [#allocation4 + $0x1], 0  ;;  %s1738_s25 = smov 0   ;;  %s1740_s26 = smov 0  }
   0x6   :  { %s1742_s27 = smov 0   ;;  %s1744_s28 = smov 0  }
   0x7   :  { %s1746_s29 = smov 0   ;;  %s1748_s30 = smov 0  }
   0x8   :  { %s1750_s14 = smov 0   ;;  %s1752_s15 = smov 0  }
   0x9 LB: > { %2074 = sst [smem:[#allocation6_spill]] %s1646_s30  ;;  %s1266_s16 = sadd.s32 4294967295, %s1654_s15   ;;  %s1654_s15 = sphi %s1752_s15, %s26_s15   ;;  %s1650_s14 = sphi %s1750_s14, %s2090_s14   ;;  %s1646_s30 = sphi %s1748_s30, %s2084_s30   ;;  %s1642_s29 = sphi %s1746_s29, %s2089_s29   ;;  %s1638_s28 = sphi %s1744_s28, %s2083_s28   ;;  %s1634_s27 = sphi %s1742_s27, %s2088_s27   ;;  %s1630_s26 = sphi %s1740_s26, %s2087_s26   ;;  %s1626_s25 = sphi %s1738_s25, %s2086_s25  }
   0xa   : > { %s35_s17 = sadd.s32 1, %s1646_s30  ;;  %s38_s18 = sadd.s32 1, %s1650_s14 }
   0xb   : > { %p36_p0 = scmp.ge.s32.totalorder %s35_s17, 2  ;;  %s45_s19 = sadd.s32 1, %s1634_s27 }
   0xc   : > { %p52_p1 = scmp.ne.s32.totalorder %s1634_s27, %s1630_s26  ;;  %p53_p2 = scmp.eq.s32.totalorder %s1654_s15, 0 }
   0xd   : > { %s2092_s17 = smov (%p36_p0, %s35_s17), 0  ;;  %s2094_s18 = smov (!%p36_p0, %s38_s18), %s1650_s14 }
   0xe   : > { %2075 = sst [smem:[#allocation7_spill]] %s2092_s17  ;;  %p58_p3 = scmp.ne.s32.totalorder %s1630_s26, %s1626_s25 }
   0xf   : > { %p40_p4 = scmp.ge.s32.totalorder %s2094_s18, 2  ;;  %p59_p5 = scmp.eq.s32.totalorder %s1266_s16, 0 }
  0x10   : > { %p1787_p6 = por %p53_p2, %p52_p1  ;;  %p1399_p8 = scmp.lt.s32.totalorder %s1654_s15, 4 }
  0x11   : > { %s2096_s18 = smov (%p40_p4, %s2094_s18), 0  ;;  %p1793_p7 = por %p59_p5, %p58_p3 }
  0x12   : > { %2077 = sst [smem:[#allocation8_spill]] %s2096_s18  ;;  %s42_s22 = ssub.s32 %s1650_s14, %s2096_s18 }
  0x13   : > { %s398_s23 = sand.u32 1, %s1634_s27   ;;  %p43_p9 = scmp.eq.s32.totalorder %s42_s22, 0 }
  0x14   : > { %s1270_s24 = sshll.u32 %s398_s23, 6  ;;  %s1333_s25 = sshll.u32 %s1650_s14, 10 }
  0x15   : > { %s1803_s17 = scalar_select %p43_p9, %s1634_s27, %s45_s19  }
  0x16   : > { %s1808_s12 = scalar_lea.hbm %s2055_s0, %s1333_s25  ;;  %s402_s9 = scalar_lea.vmem [#allocation3], %s1270_s24 }
  0x17   : > { %s409_s11 = sshll.u32 %s402_s9, 4  ;;  %p1812_p10 = pnand %p1399_p8, %p1787_p6  ;;  %s1816_s11 = int_to_ptr.vmem [resolvable:$true] %s409_s11 }
  0x18   : > { %s1818_s19 = scalar_lea.sflag [#allocation4], %s398_s23  ;;  %s1558_s30 = scalar_lea.hbm %s1808_s12, 1024 }
  0x19   : > { %p1559_p11 = scmp.ne.s32.totalorder %s1808_s12, %s1558_s30  ;;  %p1560_p12 = pneg %p1812_p10 }
  0x1a   : > { %s1563_s22 = scalar_lea.hbm %s2055_s0, 2048  ;;  %p1564_p1 = scmp.lt.u32.totalorder %s1808_s12, %s2055_s0 }
  0x1b   : > { %p1561_p13 = pnand %p1560_p12, %p1559_p11  ;;  %p1565_p2 = scmp.lt.u32.totalorder %s1563_s22, %s1558_s30 }
  0x1c   : > { %p1567_p4 = scmp.lt.u32.totalorder %s1558_s30, %s1808_s12 }
  0x1d   : > { %p1562_p0 = pneg %p1561_p13  ;;  %p1566_p3 = por %p1565_p2, %p1564_p1 }
  0x1f   : > { %p1568_p5 = por %p1567_p4, %p1566_p3 }
  0x21   : > { %p1569_p6 = pnand %p1568_p5, %p1562_p0 }
  0x23   : > { %1572 = shalt.err (!%p1569_p6)
}
  0x24   : > { %s1573_s23 = scalar_lea.vmem %s1816_s11, 1024  ;;  %s1656_s16 = smov [#allocation3]  }
  0x25   : > { %p1574_p8 = scmp.ne.s32.totalorder %s1816_s11, %s1573_s23  ;;  %s1578_s9 = sshll.u32 %s1656_s16, 4  ;;  %s1579_s9 = int_to_ptr.vmem [resolvable:$false] %s1578_s9 }
  0x26   : > { %s1580_s20 = scalar_lea.vmem %s1579_s9, 2048  ;;  %p1581_p13 = scmp.lt.s32.totalorder %s1816_s11, %s1579_s9 }
  0x27   : > { %p1576_p9 = pnand %p1574_p8, %p1560_p12  ;;  %p1582_p1 = scmp.lt.s32.totalorder %s1580_s20, %s1573_s23 }
  0x29   : > { %p1577_p11 = pneg %p1576_p9  ;;  %p1583_p2 = por %p1582_p1, %p1581_p13 }
  0x2b   : > { %p1584_p3 = pnand %p1583_p2, %p1577_p11 }
  0x2d   : > { %1587 = shalt.err (!%p1584_p3)
}
  0x2e   : > { %s1657_s30 = smov 128   ;;  %s1658_s22 = smov 8  }
  0x2f   : > { %1398 = dma.hbm_to_vmem [thread:$0]  (!%p1812_p10), %s1808_s12, 1024, %s1816_s11, %s1818_s19, %s1657_s30, %s1657_s30, %s1658_s22  }
  0x30   : > { %p1273_p12 = scmp.ge.s32.totalorder %s1654_s15, 1  ;;  %p417_p0 = scmp.lt.s32.totalorder %s1654_s15, 5 }
  0x32   : > { %p418_p4 = pnand %p1273_p12, %p417_p0 }
  0x33   : > { %s423_s24 = sand.u32 (!%p418_p4), 1, %s1630_s26  }
  0x34   : > { %421 = sbr.rel (%p418_p4) target bundleno = 905 (0x389), region = 72  ;;  %s1274_s25 = sshll.u32 (!%p418_p4), %s423_s24, 6 }
  0x35   : > { %s424_s23 = scalar_lea.sflag (!%p418_p4), [#allocation4], %s423_s24  ;;  %s1849_s16 = scalar_lea.vmem (!%p418_p4), [#allocation3], %s1274_s25 }
  0x3b   : > { %1621 = dma.done.wait (%p1793_p7), %s424_s23, 1024  }
  0x3c   : > { %1623 = vsyncadd (%p1793_p7), %s424_s23, 4294966272  ;;  %s1275_s11 = sshll.u32 %s1638_s28, 2  ;;  %p475_p10 = scmp.lt.s32.totalorder %s1642_s29, 1 }
  0x3d   : > { %p477_p5 = scmp.lt.s32.totalorder %s1275_s11, 7  ;;  %p1279_p6 = scmp.ne.s32.totalorder %s1638_s28, 0 }
  0x3e   : > { %s2098_s29 = smov (!%p475_p10, %s1642_s29), 1  ;;  %v502_v0 = vld [vmem:[%s2056_s1] sm:$0xf] (!%p1279_p6)  ;;  %vm516_vm0 = vcmask (!%p1279_p6), 1043456   ;;  %v491_v2 = vld [vmem:[%s1849_s16 + $0x8] sm:$0xff] (!%p1279_p6)  ;;  %vm503_vm1 = vcmask (!%p1279_p6), 64512  }
  0x3f   : > { %s2100_s11 = smov (!%p477_p5, %s1275_s11), 7  ;;  %s1276_s12 = sshll.u32 %s2098_s29, 3  ;;  %v490_v1 = vld [vmem:[%s1849_s16] sm:$0xff] (!%p1279_p6)  ;;  %1388 = vmatprep.subr.msk.bf16.mxu0 (!%p1279_p6), %vm516_vm0, %v502_v0  ;;  %1389 = vmatprep.subr.msk.bf16.mxu1 (!%p1279_p6), %vm516_vm0, %v502_v0  ;;  %v518_v3 = vsel (!%p1279_p6), %vm516_vm0, %v502_v0, 0  ;;  %v495_v6 = vld [vmem:[%s1849_s16 + $0x28] sm:$0xff] (!%p1279_p6)  ;;  %v492_v7 = vld [vmem:[%s1849_s16 + $0x10] sm:$0xff] (!%p1279_p6) }
  0x40   : > { %s480_s18 = sadd.s32 %s1276_s12, %s2100_s11  ;;  %489 = sbr.rel (%p1279_p6) target bundleno = 290 (0x122), region = 80  ;;  %v498_v4 = vpack.c.bf16 (!%p1279_p6), %v491_v2, %v490_v1  ;;  %v494_v5 = vld [vmem:[%s1849_s16 + $0x20] sm:$0xff] (!%p1279_p6)  ;;  %1355 = vmatpush3.bf16.msra.mxu0 (!%p1279_p6), %v518_v3  ;;  %1387 = vmatpush3.bf16.msra.mxu1 (!%p1279_p6), %v518_v3  ;;  %v493_v9 = vld [vmem:[%s1849_s16 + $0x18] sm:$0xff] (!%p1279_p6)  ;;  %v496_v10 = vld [vmem:[%s1849_s16 + $0x30] sm:$0xff] (!%p1279_p6)  ;;  %vm623_vm2 = vcmask (!%p1279_p6), 31744   ;;  %vm625_vm3 = vcmask (!%p1279_p6), 25600  }
  0x41   : > { %s1277_s19 = sshll.u32 %s480_s18, 3  ;;  %v500_v8 = vpack.c.bf16 (!%p1279_p6), %v495_v6, %v494_v5  ;;  %v497_v11 = vld [vmem:[%s1849_s16 + $0x38] sm:$0xff] (!%p1279_p6)  ;;  %v499_v12 = vpack.c.bf16 (!%p1279_p6), %v493_v9, %v492_v7  ;;  %v1659_v14 = vmov (!%p1279_p6), 0.0   ;;  %v1284_v15 = vld [vmem:[%s2057_s2] ss:$0 sm:$0xff] (!%p1279_p6) }
  0x42   : > { %s1861_s30 = scalar_lea.vmem %s2068_s13, %s1277_s19  ;;  %1356 = vmatprep.mubr.msk.bf16.mxu0 (!%p1279_p6), %vm503_vm1, %v498_v4  ;;  %v501_v13 = vpack.c.bf16 (!%p1279_p6), %v497_v11, %v496_v10  ;;  %624 = vst.msk [vmem:[#allocation2] sm:$0xff] (!%p1279_p6), %vm623_vm2, %v1659_v14  ;;  %631 = vst.msk [vmem:[#allocation2 + $0x30] sm:$0xff] (!%p1279_p6), %vm623_vm2, %v1659_v14  ;;  %v1285_v17 = vld [vmem:[%s2058_s3] ss:$0 sm:$0xff] (!%p1279_p6) }
  0x43   : > { %1360 = vmatprep.mubr.msk.bf16.mxu1 (!%p1279_p6), %vm503_vm1, %v500_v8  ;;  %1357 = vmatmul.mubr.msk.bf16.vlgmr.msra.gmra.mrb[0].mxu0 (!%p1279_p6), %vm503_vm1, %v499_v12  ;;  %626 = vst.msk [vmem:[#allocation2 + $0x8] sm:$0x3] (!%p1279_p6), %vm625_vm3, %v1659_v14  ;;  %632 = vst.msk [vmem:[#allocation2 + $0x38] sm:$0x3] (!%p1279_p6), %vm625_vm3, %v1659_v14 }
  0x44   : > { %1361 = vmatmul.mubr.msk.bf16.vlgmr.msra.gmra.mrb[0].mxu1 (!%p1279_p6), %vm503_vm1, %v501_v13  ;;  %643 = vst.msk [vmem:[#allocation2 + $0x90] sm:$0xff] (!%p1279_p6), %vm623_vm2, %v1659_v14  ;;  %627 = vst.msk [vmem:[#allocation2 + $0x10] sm:$0xff] (!%p1279_p6), %vm623_vm2, %v1659_v14 }
  0x45   : > { %644 = vst.msk [vmem:[#allocation2 + $0x98] sm:$0x3] (!%p1279_p6), %vm625_vm3, %v1659_v14  ;;  %628 = vst.msk [vmem:[#allocation2 + $0x18] sm:$0x3] (!%p1279_p6), %vm625_vm3, %v1659_v14 }
  0x46   : > { %629 = vst.msk [vmem:[#allocation2 + $0x20] sm:$0xff] (!%p1279_p6), %vm623_vm2, %v1659_v14  ;;  %633 = vst.msk [vmem:[#allocation2 + $0x40] sm:$0xff] (!%p1279_p6), %vm623_vm2, %v1659_v14 }
  0x47   : > { %630 = vst.msk [vmem:[#allocation2 + $0x28] sm:$0x3] %vm625_vm3, %v1659_v14  ;;  %634 = vst.msk [vmem:[#allocation2 + $0x48] sm:$0x3] %vm625_vm3, %v1659_v14 }
  0x48   : > { %635 = vst.msk [vmem:[#allocation2 + $0x50] sm:$0xff] %vm623_vm2, %v1659_v14  ;;  %637 = vst.msk [vmem:[#allocation2 + $0x60] sm:$0xff] %vm623_vm2, %v1659_v14 }
  0x49   : > { %636 = vst.msk [vmem:[#allocation2 + $0x58] sm:$0x3] %vm625_vm3, %v1659_v14  ;;  %638 = vst.msk [vmem:[#allocation2 + $0x68] sm:$0x3] %vm625_vm3, %v1659_v14 }
  0x4a   : > { %639 = vst.msk [vmem:[#allocation2 + $0x70] sm:$0xff] %vm623_vm2, %v1659_v14  ;;  %641 = vst.msk [vmem:[#allocation2 + $0x80] sm:$0xff] %vm623_vm2, %v1659_v14 }
  0x4b   : > { %640 = vst.msk [vmem:[#allocation2 + $0x78] sm:$0x3] %vm625_vm3, %v1659_v14  ;;  %642 = vst.msk [vmem:[#allocation2 + $0x88] sm:$0x3] %vm625_vm3, %v1659_v14 }
 0x116   : > { %v1358_v16 = vpop.f32.mrb[0].mxu0 }
 0x117   : > { %v1362_v18 = vpop.f32.mrb[0].mxu1  ;;  %v594_v19 = vmul.f32 %v1358_v16, %v1284_v15  ;;  %v554_v21 = vpop.f32.mrb[1].mxu0 }
 0x118   : > { %v598_v20 = vmul.f32 %v1362_v18, %v1284_v15  ;;  %v570_v22 = vpop.f32.mrb[1].mxu1  ;;  %v592_v23 = vmul.f32 %v1284_v15, %v554_v21  ;;  %v1359_v25 = vpop.f32.mrb[2].mxu0 }
 0x119   : > { %v596_v24 = vmul.f32 %v1284_v15, %v570_v22  ;;  %v1363_v26 = vpop.f32.mrb[2].mxu1  ;;  %v609_v27 = vadd.f32 %v1285_v17, %v594_v19  ;;  %v595_v29 = vmul.f32 %v1359_v25, %v1284_v15  ;;  %v557_v31 = vpop.f32.mrb[3].mxu0 }
 0x11a   : > { %v613_v28 = vadd.f32 %v1285_v17, %v598_v20  ;;  %v599_v30 = vmul.f32 %v1363_v26, %v1284_v15  ;;  %v573_v32 = vpop.f32.mrb[3].mxu1  ;;  %v607_v33 = vadd.f32 %v1285_v17, %v592_v23  ;;  %v593_v35 = vmul.f32 %v1284_v15, %v557_v31 }
 0x11b   : > { %v611_v34 = vadd.f32 %v1285_v17, %v596_v24  ;;  %v597_v36 = vmul.f32 %v1284_v15, %v573_v32  ;;  %v617_v37 = vmax.f32 %v609_v27, 0.0  ;;  %v610_v39 = vadd.f32 %v1285_v17, %v595_v29 }
 0x11c   : > { %v621_v38 = vmax.f32 %v613_v28, 0.0  ;;  %v614_v40 = vadd.f32 %v1285_v17, %v599_v30  ;;  %v615_v41 = vmax.f32 %v607_v33, 0.0  ;;  %v608_v43 = vadd.f32 %v1285_v17, %v593_v35 }
 0x11d   : > { %v619_v42 = vmax.f32 %v611_v34, 0.0  ;;  %v612_v44 = vadd.f32 %v1285_v17, %v597_v36  ;;  %648 = vst.msk [vmem:[#allocation2 + $0x31] sm:$0xff] %vm623_vm2, %v617_v37  ;;  %v618_v45 = vmax.f32 %v610_v39, 0.0 }
 0x11e   : > { %652 = vst.msk [vmem:[#allocation2 + $0x71] sm:$0xff] %vm623_vm2, %v621_v38  ;;  %v622_v46 = vmax.f32 %v614_v40, 0.0  ;;  %646 = vst.msk [vmem:[#allocation2 + $0x11] sm:$0xff] %vm623_vm2, %v615_v41  ;;  %v616_v47 = vmax.f32 %v608_v43, 0.0 }
 0x11f   : > { %650 = vst.msk [vmem:[#allocation2 + $0x51] sm:$0xff] %vm623_vm2, %v619_v42  ;;  %v620_v48 = vmax.f32 %v612_v44, 0.0  ;;  %649 = vst.msk [vmem:[#allocation2 + $0x41] sm:$0xff] %vm623_vm2, %v618_v45 }
 0x120   : > { %653 = vst.msk [vmem:[#allocation2 + $0x81] sm:$0xff] %vm623_vm2, %v622_v46  ;;  %647 = vst.msk [vmem:[#allocation2 + $0x21] sm:$0xff] %vm623_vm2, %v616_v47 }
 0x121   : > { %651 = vst.msk [vmem:[#allocation2 + $0x61] sm:$0xff] %vm623_vm2, %v620_v48 }
 0x122 PF: > { %s1334_s11 = sshll.u32 %s1638_s28, 6  ;;  %s1660_s18 = smov 8   ;;  %v1555_v5 = vld [vmem:[%s2059_s4] sm:$0xff]   ;;  %v1556_v9 = vld [vmem:[%s2059_s4 + $0x8] sm:$0xff]   ;;  %vm895_vm4 = vcmask 1041408   ;;  %vm826_vm5 = vcmask 31744  }
 0x123   : > { %s1914_s12 = scalar_lea.vmem [#allocation2], %s1334_s11  ;;  %s1661_s19 = smov 4   ;;  %1364 = vmatprep.subr.bf16.mxu0 %v1555_v5  ;;  %v1557_v13 = vld [vmem:[%s2059_s4 + $0x10] ss:$0 sps:$4 sm:$0x33]   ;;  %vm831_vm6 = vcmask 64512  }
 0x124   : > { %s1662_s9 = smov 12   ;;  %1365 = vmatpush3.bf16.msra.mxu0 %v1555_v5  ;;  %s1663_s22 = smov 16   ;;  %v897_v16 = vsel %vm895_vm4, %v1557_v13, 0  ;;  %vm836_vm7 = vcmask 97280   ;;  %vm841_vm8 = vcmask 130048   ;;  %vm846_vm9 = vcmask 162816  }
 0x125   : > { %1366 = vmatprep.subr.bf16.mxu0 %v1556_v9  ;;  %s1664_s25 = smov 20   ;;  %vm851_vm10 = vcmask 195584   ;;  %vm856_vm11 = vcmask 228352   ;;  %vm861_vm12 = vcmask 261120   ;;  %vm888_vm13 = vcmask 293888   ;;  %s1337_s11 = sshll.u32 %s1638_s28, 5 }
 0x126   : > { %vm1072_vm14 = vcmask 1043456  }
 0x128   : > { %v664_v49 = vld [vmem:[%s1914_s12 + $0x2] sm:$0xff]  ;;  %v665_v50 = vld [vmem:[%s1914_s12 + $0x12] sm:$0xff]  ;;  %1367 = vmatpush3.bf16.msra.mxu0 %v1556_v9 }
 0x129   : > { %v660_v51 = vld [vmem:[%s1914_s12 + $0x1] sm:$0xff]  ;;  %v1485_v52 = vpack.i.bf16 %v665_v50, %v664_v49  ;;  %v661_v53 = vld [vmem:[%s1914_s12 + $0x11] sm:$0xff]  ;;  %1390 = vmatprep.subr.msk.bf16.mxu0 %vm895_vm4, %v1557_v13 }
 0x12a   : > { %v666_v54 = vld [vmem:[%s1914_s12 + $0x22] sm:$0xff]  ;;  %v667_v55 = vld [vmem:[%s1914_s12 + $0x32] sm:$0xff]  ;;  %v1475_v56 = vpack.i.bf16 %v661_v53, %v660_v51 }
 0x12b   : > { %v662_v57 = vld [vmem:[%s1914_s12 + $0x21] sm:$0xff]  ;;  %v663_v58 = vld [vmem:[%s1914_s12 + $0x31] sm:$0xff]  ;;  %1486 = vrot.lane.b32.xlu1 %v1485_v52, %s1660_s18  ;;  %v1490_v59 = vpack.i.bf16 %v667_v55, %v666_v54  ;;  %v1515_v10 = vpack.i.bf16 %v666_v54, %v665_v50 }
 0x12c   : > { %1476 = vrot.lane.b32.xlu0 %v1475_v56, %s1661_s19  ;;  %v1480_v60 = vpack.i.bf16 %v663_v58, %v662_v57  ;;  %v1925_v61 = vld [vmem:[%s1914_s12 + $0x30] sm:$0xff]  ;;  %v1292_v62 = vld [vmem:[%s1914_s12 + $0x40] sm:$0xff]  ;;  %v1505_v6 = vpack.i.bf16 %v662_v57, %v661_v53  ;;  %1369 = vmatpush3.bf16.msra.mxu0 %v897_v16 }
 0x12d   : > { %v1929_v63 = vld [vmem:[%s1914_s12 + $0x10] sm:$0xff]  ;;  %v1932_v0 = vld [vmem:[%s1914_s12 + $0x20] sm:$0xff]  ;;  %v1500_v1 = vpack.i.bf16 %v1292_v62, %v1925_v61 }
 0x12e   : > { %v1495_v2 = vpack.i.bf16 %v1932_v0, %v1929_v63  ;;  %v1296_v3 = vld [vmem:[%s1914_s12 + $0x41] sm:$0xff]  ;;  %v1306_v11 = vld [vmem:[%s1914_s12 + $0x50] sm:$0xff]  ;;  %v1525_v14 = vpack.i.bf16 %v1925_v61, %v1932_v0 }
 0x12f   : > { %1491 = vrot.lane.b32.xlu1 %v1490_v59, %s1660_s18  ;;  %v1510_v4 = vpack.i.bf16 %v1296_v3, %v663_v58  ;;  %v1300_v7 = vld [vmem:[%s1914_s12 + $0x42] sm:$0xff]  ;;  %v1530_v12 = vpack.i.bf16 %v1306_v11, %v1292_v62  ;;  %v1310_v15 = vld [vmem:[%s1914_s12 + $0x51] sm:$0xff]  ;;  %s1665_s18 = smov 24  }
 0x130   : > { %1481 = vrot.lane.b32.xlu0 %v1480_v60, %s1661_s19  ;;  %v1520_v8 = vpack.i.bf16 %v1300_v7, %v667_v55  ;;  %v1540_v17 = vpack.i.bf16 %v1310_v15, %v1296_v3  ;;  %v1314_v18 = vld [vmem:[%s1914_s12 + $0x52] sm:$0xff]  ;;  %s1666_s19 = smov 28   ;;  %v656_v30 = vld [vmem:[%s1914_s12] sm:$0xff]  ;;  %s2080_s12 = sld [smem:[#allocation10_spill]] }
 0x131   : > { %v1550_v19 = vpack.i.bf16 %v1314_v18, %v1300_v7 }
 0x133   : > { %1501 = vrot.lane.b32.xlu1 %v1500_v1, %s1662_s9 }
 0x134   : > { %1496 = vrot.lane.b32.xlu0 %v1495_v2, %s1662_s9  ;;  %s1667_s9 = smov 32  }
 0x137   : > { %1511 = vrot.lane.b32.xlu1 %v1510_v4, %s1663_s22 }
 0x138   : > { %1506 = vrot.lane.b32.xlu0 %v1505_v6, %s1663_s22  ;;  %s2081_s22 = sld [smem:[#allocation9_spill]] }
 0x13b   : > { %1521 = vrot.lane.b32.xlu1 %v1520_v8, %s1664_s25 }
 0x13c   : > { %1516 = vrot.lane.b32.xlu0 %v1515_v10, %s1664_s25  ;;  %s2082_s25 = sld [smem:[#allocation11_spill]] }
 0x13f   : > { %1531 = vrot.lane.b32.xlu1 %v1530_v12, %s1665_s18 }
 0x140   : > { %1526 = vrot.lane.b32.xlu0 %v1525_v14, %s1665_s18  ;;  %s1058_s18 = scalar_lea.vmem %s1849_s16, %s1337_s11 [#allocation3] }
 0x143   : > { %1541 = vrot.lane.b32.xlu1 %v1540_v17, %s1666_s19 }
 0x144   : > { %1536 = vrot.lane.b32.xlu0 %v1480_v60, %s1666_s19 }
 0x147   : > { %1551 = vrot.lane.b32.xlu1 %v1550_v19, %s1667_s9 }
 0x148   : > { %1546 = vrot.lane.b32.xlu0 %v1490_v59, %s1667_s9 }
 0x19d   : > { %v1487_v20 = vpop.permute.xlu1 %1486 }
 0x19e   : > { %v1477_v21 = vpop.permute.xlu0 %1476  ;;  %v1489_v33 = vunpack.i.h.bf16 %v1487_v20  ;;  %v1488_v34 = vunpack.i.l.bf16 %v1487_v20 }
 0x19f   : > { %v1479_v27 = vunpack.i.h.bf16 %v1477_v21  ;;  %v1478_v28 = vunpack.i.l.bf16 %v1477_v21 }
 0x1a1   : > { %v1492_v22 = vpop.permute.xlu1 %1491  ;;  %v827_v36 = vsel %vm826_vm5, %v656_v30, %v1478_v28  ;;  %v828_v37 = vsel %vm826_vm5, %v1929_v63, %v1479_v27 }
 0x1a2   : > { %v1482_v23 = vpop.permute.xlu0 %1481  ;;  %v1494_v38 = vunpack.i.h.bf16 %v1492_v22  ;;  %v1493_v39 = vunpack.i.l.bf16 %v1492_v22  ;;  %v832_v47 = vsel %vm831_vm6, %v827_v36, %v1488_v34  ;;  %v833_v48 = vsel %vm831_vm6, %v828_v37, %v1489_v33 }
 0x1a3   : > { %v1484_v31 = vunpack.i.h.bf16 %v1482_v23  ;;  %v1483_v32 = vunpack.i.l.bf16 %v1482_v23 }
 0x1a5   : > { %v1502_v24 = vpop.permute.xlu1 %1501  ;;  %v829_v41 = vsel %vm826_vm5, %v1932_v0, %v1483_v32  ;;  %v830_v42 = vsel %vm826_vm5, %v1925_v61, %v1484_v31 }
 0x1a6   : > { %v1497_v25 = vpop.permute.xlu0 %1496  ;;  %v1504_v43 = vunpack.i.h.bf16 %v1502_v24  ;;  %v1503_v44 = vunpack.i.l.bf16 %v1502_v24  ;;  %v834_v50 = vsel %vm831_vm6, %v829_v41, %v1493_v39  ;;  %v835_v51 = vsel %vm831_vm6, %v830_v42, %v1494_v38  ;;  %v976_v39 = vld [vmem:[%s2062_s7] sm:$0x3] }
 0x1a7   : > { %v1499_v45 = vunpack.i.h.bf16 %v1497_v25  ;;  %v1498_v46 = vunpack.i.l.bf16 %v1497_v25  ;;  %1391 = vmatprep.subr.msk.bf16.mxu1 %vm895_vm4, %v976_v39  ;;  %v1065_v41 = vld [vmem:[%s2065_s10] sm:$0xf] }
 0x1a8   : > { %v839_v55 = vsel %vm836_vm7, %v834_v50, %v1503_v44  ;;  %v840_v56 = vsel %vm836_vm7, %v835_v51, %v1504_v43  ;;  %v1074_v42 = vsel %vm1072_vm14, %v1065_v41, 0  ;;  %v1320_v43 = vld [vmem:[%s2060_s5] ss:$0 sm:$0xff] }
 0x1a9   : > { %v1512_v26 = vpop.permute.xlu1 %1511  ;;  %v837_v59 = vsel %vm836_vm7, %v832_v47, %v1498_v46  ;;  %v838_v60 = vsel %vm836_vm7, %v833_v48, %v1499_v45  ;;  %v1321_v45 = vld [vmem:[%s2061_s6] ss:$0 sm:$0xff] }
 0x1aa   : > { %v1507_v29 = vpop.permute.xlu0 %1506  ;;  %v1514_v52 = vunpack.i.h.bf16 %v1512_v26  ;;  %v1513_v53 = vunpack.i.l.bf16 %v1512_v26 }
 0x1ab   : > { %v1509_v57 = vunpack.i.h.bf16 %v1507_v29  ;;  %v1508_v58 = vunpack.i.l.bf16 %v1507_v29 }
 0x1ac   : > { %v844_v4 = vsel %vm841_vm8, %v839_v55, %v1513_v53  ;;  %v845_v5 = vsel %vm841_vm8, %v840_v56, %v1514_v52 }
 0x1ad   : > { %v1522_v35 = vpop.permute.xlu1 %1521  ;;  %v842_v9 = vsel %vm841_vm8, %v837_v59, %v1508_v58  ;;  %v843_v10 = vsel %vm841_vm8, %v838_v60, %v1509_v57  ;;  %v1059_v59 = vld [vmem:[%s1058_s18] sm:$0xff]  ;;  %v1060_v60 = vld [vmem:[%s1058_s18 + $0x8] sm:$0xff] }
 0x1ae   : > { %v1517_v40 = vpop.permute.xlu0 %1516  ;;  %v1524_v61 = vunpack.i.h.bf16 %v1522_v35  ;;  %v1523_v62 = vunpack.i.l.bf16 %v1522_v35 }
 0x1af   : > { %v1519_v63 = vunpack.i.h.bf16 %v1517_v40  ;;  %v1518_v0 = vunpack.i.l.bf16 %v1517_v40  ;;  %v984_v40 = vsel %vm895_vm4, %v976_v39, 0 }
 0x1b0   : > { %v849_v13 = vsel %vm846_vm9, %v844_v4, %v1523_v62  ;;  %v850_v14 = vsel %vm846_vm9, %v845_v5, %v1524_v61  ;;  %1375 = vmatpush3.bf16.msra.mxu1 %v984_v40 }
 0x1b1   : > { %v1532_v49 = vpop.permute.xlu1 %1531  ;;  %v847_v17 = vsel %vm846_vm9, %v842_v9, %v1518_v0  ;;  %v848_v18 = vsel %vm846_vm9, %v843_v10, %v1519_v63  ;;  %1392 = vmatprep.subr.msk.bf16.mxu1 %vm1072_vm14, %v1065_v41  ;;  %v1324_v9 = vld [vmem:[%s2063_s8] ss:$0 sm:$0xff] }
 0x1b2   : > { %v1527_v54 = vpop.permute.xlu0 %1526  ;;  %v1534_v1 = vunpack.i.h.bf16 %v1532_v49  ;;  %v1533_v2 = vunpack.i.l.bf16 %v1532_v49  ;;  %v1329_v10 = vld [vmem:[%s2080_s12] ss:$0 sm:$0xff] }
 0x1b3   : > { %v1529_v6 = vunpack.i.h.bf16 %v1527_v54  ;;  %v1528_v7 = vunpack.i.l.bf16 %v1527_v54 }
 0x1b4   : > { %v854_v19 = vsel %vm851_vm10, %v849_v13, %v1533_v2  ;;  %v855_v20 = vsel %vm851_vm10, %v850_v14, %v1534_v1  ;;  %v1063_v1 = vpack.c.bf16 %v1060_v60, %v1059_v59  ;;  %v1061_v2 = vld [vmem:[%s1058_s18 + $0x10] sm:$0xff] }
 0x1b5   : > { %v1542_v3 = vpop.permute.xlu1 %1541  ;;  %v852_v22 = vsel %vm851_vm10, %v847_v17, %v1528_v7  ;;  %v853_v23 = vsel %vm851_vm10, %v848_v18, %v1529_v6 }
 0x1b6   : > { %v1537_v8 = vpop.permute.xlu0 %1536  ;;  %v1544_v11 = vunpack.i.h.bf16 %v1542_v3  ;;  %v1543_v12 = vunpack.i.l.bf16 %v1542_v3  ;;  %v1062_v3 = vld [vmem:[%s1058_s18 + $0x18] sm:$0xff] }
 0x1b7   : > { %v1539_v15 = vunpack.i.h.bf16 %v1537_v8  ;;  %v1538_v16 = vunpack.i.l.bf16 %v1537_v8  ;;  %v1064_v4 = vpack.c.bf16 %v1062_v3, %v1061_v2 }
 0x1b8   : > { %v859_v27 = vsel %vm856_vm11, %v854_v19, %v1543_v12  ;;  %v860_v28 = vsel %vm856_vm11, %v855_v20, %v1544_v11  ;;  %v1325_v12 = vld [vmem:[%s2081_s22] ss:$0 sm:$0xff] }
 0x1b9   : > { %v1552_v21 = vpop.permute.xlu1 %1551  ;;  %v857_v33 = vsel %vm856_vm11, %v852_v22, %v1538_v16  ;;  %v858_v34 = vsel %vm856_vm11, %v853_v23, %v1539_v15  ;;  %v1330_v15 = vld [vmem:[%s2082_s25] ss:$0 sm:$0xff] }
 0x1ba   : > { %v1554_v24 = vunpack.i.h.bf16 %v1552_v21  ;;  %v1553_v25 = vunpack.i.l.bf16 %v1552_v21  ;;  %v1547_v26 = vpop.permute.xlu0 %1546 }
 0x1bb   : > { %v1549_v29 = vunpack.i.h.bf16 %v1547_v26  ;;  %v1548_v30 = vunpack.i.l.bf16 %v1547_v26 }
 0x1bc   : > { %v864_v31 = vsel %vm861_vm12, %v859_v27, %v1553_v25  ;;  %v865_v32 = vsel %vm861_vm12, %v860_v28, %v1554_v24 }
 0x1bd   : > { %v867_v35 = vpack.c.bf16 %v865_v32, %v864_v31  ;;  %v862_v36 = vsel %vm861_vm12, %v857_v33, %v1548_v30  ;;  %v863_v37 = vsel %vm861_vm12, %v858_v34, %v1549_v29 }
 0x1be   : > { %v866_v38 = vpack.c.bf16 %v863_v37, %v862_v36 }
 0x1c0   : > { %1370 = vmatprep.mubr.msk.bf16.mxu0 %vm888_vm13, %v866_v38 }
 0x1c1   : > { %1371 = vmatmul.mubr.msk.bf16.vlgmr.msra.gmra.mrb[0].mxu0 %vm888_vm13, %v867_v35 }
 0x294   : > { %v1372_v44 = vpop.f32.mrb[0].mxu0 }
 0x295   : > { %v957_v46 = vmul.f32 %v1372_v44, %v1320_v43  ;;  %v933_v47 = vpop.f32.mrb[1].mxu0 }
 0x296   : > { %v955_v48 = vmul.f32 %v1320_v43, %v933_v47  ;;  %v1373_v49 = vpop.f32.mrb[2].mxu0 }
 0x297   : > { %v968_v50 = vadd.f32 %v1321_v45, %v957_v46  ;;  %v958_v51 = vmul.f32 %v1373_v49, %v1320_v43  ;;  %v936_v52 = vpop.f32.mrb[3].mxu0 }
 0x298   : > { %v966_v53 = vadd.f32 %v1321_v45, %v955_v48  ;;  %v956_v54 = vmul.f32 %v1320_v43, %v936_v52 }
 0x299   : > { %v969_v55 = vadd.f32 %v1321_v45, %v958_v51  ;;  %v972_v57 = vmax.f32 %v968_v50, 0.0 }
 0x29a   : > { %v967_v56 = vadd.f32 %v1321_v45, %v956_v54  ;;  %v970_v61 = vmax.f32 %v966_v53, 0.0 }
 0x29b   : > { %v973_v58 = vmax.f32 %v969_v55, 0.0 }
 0x29c   : > { %v971_v62 = vmax.f32 %v967_v56, 0.0 }
 0x29d   : > { %v975_v63 = vpack.c.bf16 %v973_v58, %v972_v57 }
 0x29e   : > { %v974_v0 = vpack.c.bf16 %v971_v62, %v970_v61 }
 0x2a0   : > { %1376 = vmatprep.mubr.msk.bf16.mxu1 %vm826_vm5, %v974_v0 }
 0x2a1   : > { %1377 = vmatmul.mubr.msk.bf16.vlgmr.msra.gmra.mrb[0].mxu1 %vm826_vm5, %v975_v63 }
 0x2a2   : > { %1381 = vmatpush3.bf16.msra.mxu1 %v1074_v42  ;;  %1382 = vmatprep.mubr.msk.bf16.mxu1 %vm831_vm6, %v1063_v1 }
 0x2a9   : > { %1383 = vmatmul.mubr.msk.bf16.vlgmr.msra.gmra.mrb[4].mxu1 %vm831_vm6, %v1064_v4 }
 0x374   : > { %v1378_v5 = vpop.f32.mrb[0].mxu1 }
 0x375   : > { %v1020_v6 = vpop.f32.mrb[1].mxu1  ;;  %v1044_v11 = vmul.f32 %v1378_v5, %v1324_v9 }
 0x376   : > { %v1379_v7 = vpop.f32.mrb[2].mxu1  ;;  %v1042_v13 = vmul.f32 %v1324_v9, %v1020_v6 }
 0x377   : > { %v1023_v8 = vpop.f32.mrb[3].mxu1  ;;  %v1045_v16 = vmul.f32 %v1379_v7, %v1324_v9  ;;  %v1055_v22 = vadd.f32 %v1325_v12, %v1044_v11 }
 0x378   : > { %v1043_v19 = vmul.f32 %v1324_v9, %v1023_v8  ;;  %v1053_v26 = vadd.f32 %v1325_v12, %v1042_v13 }
 0x379   : > { %v1056_v29 = vadd.f32 %v1325_v12, %v1045_v16 }
 0x37a   : > { %v1054_v32 = vadd.f32 %v1325_v12, %v1043_v19 }
 0x37c   : > { %v1384_v14 = vpop.f32.mrb[4].mxu1 }
 0x37d   : > { %v1134_v17 = vmul.f32 %v1384_v14, %v1329_v10  ;;  %v1110_v18 = vpop.f32.mrb[5].mxu1 }
 0x37e   : > { %v1132_v20 = vmul.f32 %v1329_v10, %v1110_v18  ;;  %v1385_v21 = vpop.f32.mrb[6].mxu1 }
 0x37f   : > { %v1145_v23 = vadd.f32 %v1330_v15, %v1134_v17  ;;  %v1135_v24 = vmul.f32 %v1385_v21, %v1329_v10  ;;  %v1113_v25 = vpop.f32.mrb[7].mxu1 }
 0x380   : > { %v1143_v27 = vadd.f32 %v1330_v15, %v1132_v20  ;;  %v1133_v28 = vmul.f32 %v1329_v10, %v1113_v25 }
 0x381   : > { %v1149_v30 = vadd.f32 %v1145_v23, %v1055_v22  ;;  %v1146_v31 = vadd.f32 %v1330_v15, %v1135_v24 }
 0x382   : > { %v1147_v33 = vadd.f32 %v1143_v27, %v1053_v26  ;;  %v1144_v34 = vadd.f32 %v1330_v15, %v1133_v28 }
 0x383   : > { %v1153_v35 = vmax.f32 %v1149_v30, 0.0  ;;  %v1150_v36 = vadd.f32 %v1146_v31, %v1056_v29 }
 0x384   : > { %v1151_v37 = vmax.f32 %v1147_v33, 0.0  ;;  %v1148_v38 = vadd.f32 %v1144_v34, %v1054_v32 }
 0x385   : > { %1157 = vst.msk [vmem:[%s1861_s30 + $0x10] sm:$0xff] %vm841_vm8, %v1153_v35  ;;  %v1154_v39 = vmax.f32 %v1150_v36, 0.0 }
 0x386   : > { %1155 = vst.msk [vmem:[%s1861_s30] sm:$0xff] %vm841_vm8, %v1151_v37  ;;  %v1152_v40 = vmax.f32 %v1148_v38, 0.0 }
 0x387   : > { %1158 = vst.msk [vmem:[%s1861_s30 + $0x18] sm:$0xff] %vm841_vm8, %v1154_v39 }
 0x388   : > { %1156 = vst.msk [vmem:[%s1861_s30 + $0x8] sm:$0xff] %vm841_vm8, %v1152_v40 }
 0x389 PF: > { %s26_s15 = sadd.s32 1, %s1654_s15   ;;  %s2083_s28 = sld [smem:[#allocation6_spill]] }
 0x38a   : > { %p23_p7 = scmp.ge.s32.totalorder %s26_s15, 6   ;;  %s2084_s30 = sld [smem:[#allocation7_spill]] }
 0x38b   : > { %s2085_s23 = sld [smem:[#allocation8_spill]]  ;;  %s2086_s25 = smov %s1630_s26 }
 0x38c   : > { %s2087_s26 = smov %s1634_s27  ;;  %s2088_s27 = smov %s1803_s17 }
 0x38d   : > { %s2089_s29 = smov %s1650_s14  ;;  %25 = sbr.rel (!%p23_p7) target bundleno = 9 (0x9), region = 121 }
 0x391   : > { %s2090_s14 = smov %s2085_s23 }
 0x394   :  { %1189 = vsyncpa [#allocation4], 1 }
 0x395   :  { %1191 = vsyncpa [#allocation4 + $0x1], 1 }

</bundles_post_ra>
